<compile_context>
chip_gen: v7x
topology: tpu7x:2x2x1
jax: 0.10.0
libtpu: 0.0.40
codegen_flags: <defaults>
</compile_context>

<pallas_src>
import jax
import jax.numpy as jnp
from jax.experimental import pallas as pl
from jax.experimental.pallas import tpu as pltpu


def _round_up(x, m):
    return ((x + m - 1) // m) * m


def _sublane_multiple(dtype):
    itemsize = jnp.dtype(dtype).itemsize
    if itemsize >= 4:
        return 8      # f32 / i32
    if itemsize == 2:
        return 16     # bf16 packs 2-per-sublane
    return 32         # int8 / fp8


def _pad_cyclic_kernel_roll(x_ref, o_ref):
    # Lane-aligned path (L % 128 == 0): rolled tile already carries x[:, L-1]
    # in lane 0, so the bulk store is a single unmasked offset-0 store; only
    # the two trailing wrap lanes need masked single-lane stores.
    L = x_ref.shape[-1]
    x = x_ref[...]
    o_ref[:, 0:L] = pltpu.roll(x, shift=1, axis=1)
    o_ref[:, L:L + 1] = x[:, L - 1:L]
    o_ref[:, L + 1:L + 2] = x[:, 0:1]


def _pad_cyclic_kernel_direct(x_ref, o_ref):
    # Lane-unaligned path: three direct stores (bulk interior + two wrap
    # lanes); no (rows, L+2) concatenated value is built in vregs.
    L = x_ref.shape[-1]
    o_ref[:, 1:L + 1] = x_ref[...]
    o_ref[:, 0:1] = x_ref[:, L - 1:L]
    o_ref[:, L + 1:L + 2] = x_ref[:, 0:1]


def pad_cyclic_1d(x):
    """Cyclic pad of width 1 along the last axis of a (N, C, L) array."""
    N, C, L = x.shape
    rows = N * C
    itemsize = jnp.dtype(x.dtype).itemsize
    mult = _sublane_multiple(x.dtype)

    # Collapse leading dims so each grid step streams a large dense row slab.
    x2 = x.reshape(rows, L)

    # ---- VMEM accounting with real (lane-padded) tile widths ---------------
    lanes_in = _round_up(L, 128)
    lanes_out = _round_up(L + 2, 128)
    row_tile_bytes = (lanes_in + lanes_out) * itemsize       # one in+out buffer row
    row_pipelined_bytes = 2 * row_tile_bytes                 # double-buffered

    # Generation-aware budget; conservative (v7x-sized) fallback.
    try:
        phys_vmem = int(pltpu.get_tpu_info().vmem_capacity_bytes)
    except Exception:
        phys_vmem = 64 * 1024 * 1024
    vmem_budget = (24 << 20) if phys_vmem >= (128 << 20) else (16 << 20)

    max_tr = max(mult, (vmem_budget // row_pipelined_bytes) // mult * mult)

    # ---- Grid sizing --------------------------------------------------------
    target_steps = 8
    min_tr_1mib = max(mult, _round_up(pl.cdiv(1 << 20, row_tile_bytes), mult))
    tr_for_steps = max(mult, _round_up(pl.cdiv(rows, target_steps), mult))
    tr = min(max_tr, max(min_tr_1mib, tr_for_steps))
    if rows >= 2 * mult:
        # Never collapse to grid=(1,) when the rows can be split: keeps both
        # v7x TensorCores busy and overlaps writeback of block i with the
        # read of block i+1.
        tr = min(tr, _round_up(pl.cdiv(rows, 2), mult))
    if tr >= rows:
        tr = rows                      # single full-extent block (always legal)
    grid = (pl.cdiv(rows, tr),)

    # VMEM limit from the actual padded double-buffered footprint + headroom.
    footprint = 2 * tr * row_tile_bytes
    vmem_limit = int(min(phys_vmem // 2,
                         max(8 << 20, footprint + footprint // 2)))

    kernel = (_pad_cyclic_kernel_roll
              if (L % 128 == 0 and L >= 128)
              else _pad_cyclic_kernel_direct)

    out2 = pl.pallas_call(
        kernel,
        out_shape=jax.ShapeDtypeStruct((rows, L + 2), x.dtype),
        grid=grid,
        in_specs=[pl.BlockSpec((tr, L), lambda i: (i, 0))],
        out_specs=pl.BlockSpec((tr, L + 2), lambda i: (i, 0)),
        compiler_params=pltpu.CompilerParams(
            dimension_semantics=("parallel",),
            vmem_limit_bytes=vmem_limit,
        ),
        cost_estimate=pl.CostEstimate(
            flops=0,
            transcendentals=0,
            bytes_accessed=rows * (L + (L + 2)) * itemsize,
        ),
    )(x2)

    return out2.reshape(N, C, L + 2)


def _reference(x):
    return jnp.concatenate([x[:, :, -1:], x, x[:, :, :1]], axis=-1)


if __name__ == "__main__":
    key = jax.random.PRNGKey(0)
    k1, k2 = jax.random.split(key)

    # Case 1: small, lane-unaligned L (direct-store kernel, single block).
    N, C, L = 2, 4, 16
    x_small = jax.random.normal(k1, (N, C, L), dtype=jnp.float32)
    out_small = jax.block_until_ready(pad_cyclic_1d(x_small))
    assert out_small.shape == (N, C, L + 2), out_small.shape
    assert jnp.array_equal(out_small, _reference(x_small)), "mismatch (L=16)"

    # Case 2: lane-aligned L (pltpu.roll kernel), rows not divisible by the
    # row tile -> exercises >=2 grid steps and the partial (masked) last block.
    N2, C2, L2 = 3, 7, 128
    x_big = jax.random.normal(k2, (N2, C2, L2), dtype=jnp.float32)
    out_big = jax.block_until_ready(pad_cyclic_1d(x_big))
    assert out_big.shape == (N2, C2, L2 + 2), out_big.shape
    assert jnp.array_equal(out_big, _reference(x_big)), "mismatch (L=128)"

    print("KERNEL_OK")
</pallas_src>

<mosaic_0001>
module attributes {stable_mosaic.version = 11 : i64} {
  func.func @_pad_cyclic_kernel_direct(%arg0: i32, %arg1: memref<8x16xf32, #tpu.memory_space<vmem>>, %arg2: memref<8x18xf32, #tpu.memory_space<vmem>>) attributes {dimension_semantics = [#tpu.dimension_semantics<parallel>], iteration_bounds = array<i64: 1>, scalar_prefetch = 0 : i64, scratch_operands = 0 : i64, tpu.core_type = #tpu.core_type<tc>, window_params = [{transform_indices = @transform_0, window_bounds = array<i64: 8, 16>}, {transform_indices = @transform_1, window_bounds = array<i64: 8, 18>}]} {
    %c0 = arith.constant 0 : index
    %c0_0 = arith.constant 0 : index
    %0 = vector.load %arg1[%c0, %c0_0] : memref<8x16xf32, #tpu.memory_space<vmem>>, vector<8x16xf32>
    %c0_1 = arith.constant 0 : index
    %c1 = arith.constant 1 : index
    %1 = vector.load %arg2[%c0_1, %c1] : memref<8x18xf32, #tpu.memory_space<vmem>>, vector<8x16xf32>
    tpu.vector_store %arg2[%c0_1, %c1], %0 {strides = array<i32>} : memref<8x18xf32, #tpu.memory_space<vmem>>, vector<8x16xf32>,
    %c0_2 = arith.constant 0 : index
    %c15 = arith.constant 15 : index
    %2 = vector.load %arg1[%c0_2, %c15] : memref<8x16xf32, #tpu.memory_space<vmem>>, vector<8x1xf32>
    %c0_3 = arith.constant 0 : index
    %c0_4 = arith.constant 0 : index
    %3 = vector.load %arg2[%c0_3, %c0_4] : memref<8x18xf32, #tpu.memory_space<vmem>>, vector<8x1xf32>
    tpu.vector_store %arg2[%c0_3, %c0_4], %2 {strides = array<i32>} : memref<8x18xf32, #tpu.memory_space<vmem>>, vector<8x1xf32>,
    %c0_5 = arith.constant 0 : index
    %c0_6 = arith.constant 0 : index
    %4 = vector.load %arg1[%c0_5, %c0_6] : memref<8x16xf32, #tpu.memory_space<vmem>>, vector<8x1xf32>
    %c0_7 = arith.constant 0 : index
    %c17 = arith.constant 17 : index
    %5 = vector.load %arg2[%c0_7, %c17] : memref<8x18xf32, #tpu.memory_space<vmem>>, vector<8x1xf32>
    tpu.vector_store %arg2[%c0_7, %c17], %4 {strides = array<i32>} : memref<8x18xf32, #tpu.memory_space<vmem>>, vector<8x1xf32>,
    return
  }
  func.func @transform_0(%arg0: i32) -> (i32, i32) {
    %c0_i32 = arith.constant 0 : i32
    %c0_i32_0 = arith.constant 0 : i32
    return %arg0, %c0_i32 : i32, i32
  }
  func.func @transform_1(%arg0: i32) -> (i32, i32) {
    %c0_i32 = arith.constant 0 : i32
    %c0_i32_0 = arith.constant 0 : i32
    return %arg0, %c0_i32 : i32, i32
  }
}

</mosaic_0001>

<bundles_post_ra>
// kernel: tpu_custom_call.1
= control target key start
LH: loop header
LB: loop body
LE: loop exit
PB: predicated region body
PF: predicated region fallthrough
CT: control target
= control target key end

     0   :  { %6 = vsyncpa [#allocation3], 0  ;;  %s149_s0 = inlined_call_operand.hbm [shape: f32[8,16], index: 0, kind: input, shape index: {}]   ;;  %s150_s1 = inlined_call_operand.hbm [shape: f32[8,18], index: 1, kind: output, shape index: {}]  }
   0x1   :  { %7 = vsyncpa [#allocation4], 0  ;;  %s110_s6 = smov [#allocation2]   ;;  %s62_s10 = scalar_lea.hbm %s149_s0, 128 }
   0x2   :  { %s14_s7 = sshll.u32 %s110_s6, 4  ;;  %p63_p0 = scmp.ne.s32.totalorder %s149_s0, %s62_s10  ;;  %s15_s7 = int_to_ptr.vmem [resolvable:$true] %s14_s7 }
   0x3   :  { %p66_p1 = scmp.lt.u32.totalorder %s62_s10, %s149_s0 }
   0x5   :  { %p68_p2 = pnand %p66_p1, %p63_p0 }
   0x7   :  { %71 = shalt.err (!%p68_p2)
}
   0x8   :  { %s72_s15 = scalar_lea.vmem %s15_s7, 128  ;;  %p77_p4 = scmp.lt.s32.totalorder %s15_s7, %s15_s7 }
   0x9   :  { %p73_p3 = scmp.ne.s32.totalorder %s15_s7, %s72_s15  ;;  %p78_p5 = scmp.lt.s32.totalorder %s72_s15, %s72_s15 }
   0xb   :  { %p79_p6 = por %p78_p5, %p77_p4 }
   0xd   :  { %p80_p7 = pnand %p79_p6, %p73_p3 }
   0xf   :  { %83 = shalt.err (!%p80_p7)
}
  0x10   :  { %17 = dma.hbm_to_vmem [thread:$0]  %s149_s0, 128, %s15_s7, [#allocation3]  }
  0x11   :  { %106 = dma.done.wait [#allocation3], 128  }
  0x12   :  { %107 = vsyncadd [#allocation3], 4294967168  ;;  %v21_v0 = vld [vmem:[#allocation2] sm:$0xff]  ;;  %s111_s18 = smov 1   ;;  %s112_s19 = smov 17   ;;  %vm26_vm0 = vcmask 138248  }
  0x13   :  { %23 = vrot.lane.b32.xlu0 %v21_v0, %s111_s18  ;;  %37 = vrot.lane.b32.xlu1 %v21_v0, %s112_s19  ;;  %s113_s20 = smov 113   ;;  %s114_s21 = smov [#allocation5]   ;;  %vm33_vm1 = vcmask 7168   ;;  %vm40_vm2 = vcmask 146568  }
  0x14   :  { %s48_s22 = sshll.u32 %s114_s21, 4  ;;  %s49_s22 = int_to_ptr.vmem [resolvable:$true] %s48_s22 }
  0x15   :  { %s84_s0 = scalar_lea.vmem %s49_s22, 128  ;;  %p89_p9 = scmp.lt.s32.totalorder %s49_s22, %s49_s22 }
  0x16   :  { %p85_p8 = scmp.ne.s32.totalorder %s49_s22, %s84_s0  ;;  %p90_p10 = scmp.lt.s32.totalorder %s84_s0, %s84_s0 }
  0x17   :  { %30 = vrot.lane.b32.xlu0 %v21_v0, %s113_s20 }
  0x18   :  { %p91_p11 = por %p90_p10, %p89_p9 }
  0x1a   :  { %p92_p12 = pnand %p91_p11, %p85_p8 }
  0x85   :  { %v24_v1 = vpop.permute.xlu0 %23  ;;  %v38_v2 = vpop.permute.xlu1 %37 }
  0x86   :  { %27 = vst.msk [vmem:[#allocation5] sm:$0xff] %vm26_vm0, %v24_v1 }
  0x89   :  { %v31_v3 = vpop.permute.xlu0 %30 }
  0x8a   :  { %34 = vst.msk [vmem:[#allocation5] sm:$0xff] %vm33_vm1, %v31_v3 }
  0x8b   :  { %41 = vst.msk [vmem:[#allocation5] sm:$0xff] %vm40_vm2, %v38_v2 }
  0x8c   :  { %95 = shalt.err (!%p92_p12)
}
  0x8d   :  { %s96_s25 = scalar_lea.hbm %s150_s1, 128 }
  0x8e   :  { %p97_p13 = scmp.ne.s32.totalorder %s150_s1, %s96_s25  ;;  %p100_p0 = scmp.lt.u32.totalorder %s96_s25, %s150_s1 }
  0x90   :  { %p102_p1 = pnand %p100_p0, %p97_p13 }
  0x92   :  { %105 = shalt.err (!%p102_p1)
}
  0x93   :  { %51 = dma.vmem_to_hbm [thread:$0]  %s49_s22, 128, %s150_s1, [#allocation4]  }
  0x94   :  { %108 = dma.done.wait [#allocation4], 128  }
  0x95   :  { %109 = vsyncadd [#allocation4], 4294967168 }
  0x96   :  { %55 = vsyncpa [#allocation3], 1 }
  0x97   :  { %56 = vsyncpa [#allocation4], 1 }

</bundles_post_ra>
